<compile_context>
chip_gen: v5e
topology: v5e:2x2
jax: 0.10.0
libtpu: 0.0.40
codegen_flags: <defaults>
</compile_context>

<pallas_src>
import functools

import jax
import jax.numpy as jnp
import numpy as np
from jax.experimental import pallas as pl
from jax.experimental.pallas import tpu as pltpu

HIDDEN = 2000                          # hidden width fixed by the PyTorch module
HIDDEN_PAD = 2048                      # padded to a multiple of 128 lanes
VMEM_LIMIT_BYTES = 32 * 1024 * 1024    # safe on v5e/v6e/v7x


def _round_up(n, m):
    return -(-n // m) * m


def _pad_last(a, n):
    pad = n - a.shape[-1]
    return a if pad <= 0 else jnp.pad(a, [(0, 0)] * (a.ndim - 1) + [(0, pad)])


def _pad_to(a, shape):
    pads = [(0, t - s) for s, t in zip(a.shape, shape)]
    return jnp.pad(a, pads) if any(p for _, p in pads) else a


# ----------------------------- Pallas kernels ------------------------------

def _linear_kernel(x_ref, w_ref, b_ref, o_ref, *, apply_relu):
    """o = act(x @ W + b).  Grid = (m tiles, k tiles); o_ref is the accumulator."""
    k = pl.program_id(1)

    @pl.when(k == 0)
    def _():
        o_ref[...] = jnp.zeros_like(o_ref)

    o_ref[...] += jnp.dot(x_ref[...].astype(w_ref.dtype), w_ref[...],
                          preferred_element_type=jnp.float32)

    @pl.when(k == pl.num_programs(1) - 1)
    def _():
        y = o_ref[...] + b_ref[...]
        if apply_relu:
            y = jnp.maximum(y, 0.0)
        o_ref[...] = y


def _stack_kernel(x0_ref, w_ref, b_ref, wo_ref, bo_ref, o_ref, h_ref, *, has_skip):
    """Fused tower + output projection.

    Grid = (m tiles, layer).  Per layer l:
        h <- relu(h @ W_l + b_l) [+ x0 on odd l when skip is enabled]
    and on the last layer the output projection  o = h @ Wo + bo  is applied.
    The running activation `h` stays resident in VMEM scratch; only W_l is
    streamed from HBM.  x0 doubles as both the stack input and the skip tensor.
    """
    l = pl.program_id(1)
    n_layers = pl.num_programs(1)

    @pl.when(l == 0)
    def _():
        h_ref[...] = x0_ref[...]

    y = jnp.dot(h_ref[...].astype(jnp.bfloat16), w_ref[0],
                preferred_element_type=jnp.float32)
    y = jnp.maximum(y + b_ref[0], 0.0)
    if has_skip:
        # PyTorch adds input_skip after layers 2/4/6 == stack indices 1/3/5.
        y = jnp.where(l % 2 == 1, y + x0_ref[...], y)
    h_ref[...] = y

    @pl.when(l == n_layers - 1)
    def _():
        o_ref[...] = (jnp.dot(y.astype(jnp.bfloat16), wo_ref[...],
                              preferred_element_type=jnp.float32)
                      + bo_ref[...])


# ------------------------------ pallas wrappers -----------------------------

def linear_pallas(x, w, b, *, apply_relu, tm, tk):
    """y = act(x @ W + b); x [M,K] f32, w [K,N] bf16, b [N] f32."""
    M, K = x.shape
    Kw, N = w.shape
    assert K == Kw and M % tm == 0 and K % tk == 0
    grid = (M // tm, K // tk)

    return pl.pallas_call(
        functools.partial(_linear_kernel, apply_relu=apply_relu),
        out_shape=jax.ShapeDtypeStruct((M, N), jnp.float32),
        grid_spec=pltpu.PrefetchScalarGridSpec(
            num_scalar_prefetch=0,
            grid=grid,
            in_specs=[
                pl.BlockSpec((tm, tk), lambda m, k: (m, k)),   # activations
                pl.BlockSpec((tk, N), lambda m, k: (k, 0)),    # bf16 weights
                pl.BlockSpec((1, N), lambda m, k: (0, 0)),     # bias (resident)
            ],
            out_specs=pl.BlockSpec((tm, N), lambda m, k: (m, 0)),
        ),
        compiler_params=pltpu.CompilerParams(
            dimension_semantics=("parallel", "arbitrary"),
            vmem_limit_bytes=VMEM_LIMIT_BYTES),
        cost_estimate=pl.CostEstimate(
            flops=2 * M * K * N, transcendentals=0,
            bytes_accessed=int(M * K * 4 + K * N * 2 + N * 4 + M * N * 4)),
    )(x, w, b.reshape(1, N))


def stack_pallas(x0, w_stack, b_stack, wo, bo, *, has_skip, tm):
    """Fused hidden tower + output layer.

    x0      [M_pad, H]  f32  -- stack input (== skip tensor when has_skip)
    w_stack [L, H, H]   bf16 -- streamed per-layer weights
    b_stack [L, 1, H]   f32
    wo      [H, Np]     bf16 -- output projection (VMEM-resident)
    bo      [1, Np]     f32
    """
    M_pad, H = x0.shape
    L = w_stack.shape[0]
    Np = wo.shape[1]
    assert M_pad % tm == 0
    MT = M_pad // tm

    return pl.pallas_call(
        functools.partial(_stack_kernel, has_skip=has_skip),
        out_shape=jax.ShapeDtypeStruct((M_pad, Np), jnp.float32),
        grid_spec=pltpu.PrefetchScalarGridSpec(
            num_scalar_prefetch=0,
            grid=(MT, L),                                       # layer axis last
            in_specs=[
                pl.BlockSpec((tm, H), lambda m, l: (m, 0)),     # x0 / skip (resident)
                pl.BlockSpec((1, H, H), lambda m, l: (l, 0, 0)),  # streamed weights
                pl.BlockSpec((1, 1, H), lambda m, l: (l, 0, 0)),  # per-layer bias
                pl.BlockSpec((H, Np), lambda m, l: (0, 0)),     # output W (resident)
                pl.BlockSpec((1, Np), lambda m, l: (0, 0)),     # output b (resident)
            ],
            out_specs=pl.BlockSpec((tm, Np), lambda m, l: (m, 0)),
            scratch_shapes=[pltpu.VMEM((tm, H), jnp.float32)],  # resident activation
        ),
        compiler_params=pltpu.CompilerParams(
            dimension_semantics=("parallel", "arbitrary"),
            vmem_limit_bytes=VMEM_LIMIT_BYTES),
        cost_estimate=pl.CostEstimate(
            flops=2 * M_pad * H * (H * L + Np),
            transcendentals=0,
            bytes_accessed=int(L * H * H * 2 + H * Np * 2
                               + M_pad * H * 4 + M_pad * Np * 4)),
    )(x0, w_stack, b_stack, wo, bo)


# --------------------------- parameters & glue ------------------------------

def init_params(key, input_dim, output_dim):
    """Synthetic init matching nn.Linear shapes (U(-1/sqrt(fan_in), ...)).
    Weights are stored [in_features, out_features] (y = x @ W + b)."""
    dims = [(input_dim, HIDDEN)] + [(HIDDEN, HIDDEN)] * 5 + [(HIDDEN, output_dim)]
    params = []
    for fan_in, fan_out in dims:
        kw, kb, key = jax.random.split(key, 3)
        bound = 1.0 / np.sqrt(fan_in)
        w = jax.random.uniform(kw, (fan_in, fan_out), jnp.float32, -bound, bound)
        b = jax.random.uniform(kb, (fan_out,), jnp.float32, -bound, bound)
        params.append((w, b))
    return params


def prepare_params(params):
    """Pad to TPU-friendly shapes, cast weights to bf16, stack tower layers.
    Done once (outside the forward) so no per-call padding/cast traffic."""
    (w1, b1) = params[0]
    hidden = params[1:6]
    (wo, bo) = params[6]
    d_in = w1.shape[0]
    d_out = wo.shape[1]
    has_skip = (d_in == HIDDEN)      # static: torch's x.shape == input_skip.shape

    hid_w = [_pad_to(w, (HIDDEN_PAD, HIDDEN_PAD)) for w, _ in hidden]
    hid_b = [_pad_last(b, HIDDEN_PAD) for _, b in hidden]

    if has_skip:
        # layer1 has the same padded shape -> fold it into the streamed stack.
        stack_w = [_pad_to(w1, (HIDDEN_PAD, HIDDEN_PAD))] + hid_w
        stack_b = [_pad_last(b1, HIDDEN_PAD)] + hid_b
        w1p = b1p = None
        tk1 = None
    else:
        stack_w, stack_b = hid_w, hid_b
        k1 = _round_up(d_in, 8)
        tk1 = k1 if k1 <= 2048 else 1024       # k-tile layer1 only if huge
        k1 = _round_up(k1, tk1)
        w1p = _pad_to(w1, (k1, HIDDEN_PAD)).astype(jnp.bfloat16)
        b1p = _pad_last(b1, HIDDEN_PAD)

    n_pad = max(128, _round_up(d_out, 128))
    return dict(
        has_skip=has_skip, d_out=d_out, tk1=tk1,
        w1=w1p, b1=b1p,
        w_stack=jnp.stack(stack_w).astype(jnp.bfloat16),   # [L,2048,2048] bf16
        b_stack=jnp.stack(stack_b)[:, None, :],            # [L,1,2048] f32
        wo=_pad_to(wo, (HIDDEN_PAD, n_pad)).astype(jnp.bfloat16),
        bo=_pad_last(bo, n_pad).reshape(1, n_pad),
    )


def h_theta_skip_forward(prep, x):
    """x: [B, S, input_dim] float32 -> [B, S, output_dim] float32."""
    B, S, d_in = x.shape
    d_out = prep["d_out"]
    M = B * S
    tm = _round_up(M, 8) if M <= 256 else 256
    M_pad = _round_up(M, tm)

    xf = x.reshape(M, d_in).astype(jnp.float32)
    if M_pad != M:
        xf = jnp.pad(xf, ((0, M_pad - M), (0, 0)))

    if prep["has_skip"]:
        x0 = _pad_last(xf, HIDDEN_PAD)           # stack input == skip tensor
    else:
        x1 = _pad_last(xf, prep["w1"].shape[0])  # zero-pad layer-1 input (inert)
        x0 = linear_pallas(x1, prep["w1"], prep["b1"],
                           apply_relu=True, tm=tm, tk=prep["tk1"])

    out = stack_pallas(x0, prep["w_stack"], prep["b_stack"], prep["wo"], prep["bo"],
                       has_skip=prep["has_skip"], tm=tm)
    return out[:M, :d_out].reshape(B, S, d_out)


# ------------------------------- references ---------------------------------

def reference_forward(params, x):
    """Pure-JAX reference of the PyTorch forward."""
    input_skip = x
    h = x
    for i, (w, b) in enumerate(params[:-1]):
        h = jnp.maximum(h @ w + b, 0.0)
        if i % 2 == 1 and h.shape == input_skip.shape:
            h = h + input_skip
    w, b = params[-1]
    return h @ w + b


def _bf16_weights(params):
    """Weights rounded to bf16 (what the kernel streams); biases stay f32."""
    return [(w.astype(jnp.bfloat16).astype(jnp.float32), b) for w, b in params]


# ---------------------------------- main ------------------------------------

if __name__ == "__main__":
    key = jax.random.PRNGKey(0)
    kx1, kp1, kx2, kp2 = jax.random.split(key, 4)

    # Case 1: [batch, sequence, features] with input_dim != 2000 (no skip).
    B, S, D_IN, D_OUT = 2, 8, 3, 3
    x1 = jax.random.normal(kx1, (B, S, D_IN), jnp.float32)
    params1 = init_params(kp1, D_IN, D_OUT)
    out1 = jax.block_until_ready(h_theta_skip_forward(prepare_params(params1), x1))
    assert out1.shape == (B, S, D_OUT)
    np.testing.assert_allclose(np.asarray(out1),
                               np.asarray(reference_forward(_bf16_weights(params1), x1)),
                               rtol=2e-2, atol=2e-2)
    np.testing.assert_allclose(np.asarray(out1),
                               np.asarray(reference_forward(params1, x1)),
                               rtol=5e-2, atol=5e-2)

    # Case 2: input_dim == 2000 so the skip connections fire.
    B2, S2, D_OUT2 = 1, 8, 4
    x2 = jax.random.normal(kx2, (B2, S2, HIDDEN), jnp.float32)
    params2 = init_params(kp2, HIDDEN, D_OUT2)
    out2 = jax.block_until_ready(h_theta_skip_forward(prepare_params(params2), x2))
    assert out2.shape == (B2, S2, D_OUT2)
    np.testing.assert_allclose(np.asarray(out2),
                               np.asarray(reference_forward(_bf16_weights(params2), x2)),
                               rtol=2e-2, atol=2e-2)
    np.testing.assert_allclose(np.asarray(out2),
                               np.asarray(reference_forward(params2, x2)),
                               rtol=5e-2, atol=5e-2)

    print("KERNEL_OK")
</pallas_src>

<mosaic_0001>
module attributes {stable_mosaic.version = 11 : i64} {
  func.func @_linear_kernel(%arg0: i32, %arg1: i32, %arg2: memref<16x8xf32, #tpu.memory_space<vmem>>, %arg3: memref<8x2048xbf16, #tpu.memory_space<vmem>>, %arg4: memref<1x2048xf32, #tpu.memory_space<vmem>>, %arg5: memref<16x2048xf32, #tpu.memory_space<vmem>>) attributes {dimension_semantics = [#tpu.dimension_semantics<parallel>, #tpu.dimension_semantics<arbitrary>], iteration_bounds = array<i64: 1, 1>, scalar_prefetch = 0 : i64, scratch_operands = 0 : i64, tpu.core_type = #tpu.core_type<tc>, window_params = [{transform_indices = @transform_0, window_bounds = array<i64: 16, 8>}, {transform_indices = @transform_1, window_bounds = array<i64: 8, 2048>}, {pipeline_mode = #tpu.pipeline_mode<synchronous>, transform_indices = @transform_2, window_bounds = array<i64: 1, 2048>}, {transform_indices = @transform_3, window_bounds = array<i64: 16, 2048>}]} {
    %c0_i32 = arith.constant 0 : i32
    %0 = arith.cmpi eq, %arg1, %c0_i32 : i32
    %1 = arith.extui %0 : i1 to i32
    %c0_i32_0 = arith.constant 0 : i32
    %2 = arith.cmpi ne, %1, %c0_i32_0 : i32
    scf.if %2 {
      %cst_10 = arith.constant 0.000000e+00 : f32
      %13 = vector.broadcast %cst_10 : f32 to vector<16x2048xf32>
      %c0_11 = arith.constant 0 : index
      %c0_12 = arith.constant 0 : index
      %14 = vector.load %arg5[%c0_11, %c0_12] : memref<16x2048xf32, #tpu.memory_space<vmem>>, vector<16x2048xf32>
      tpu.vector_store %arg5[%c0_11, %c0_12], %13 {strides = array<i32>} : memref<16x2048xf32, #tpu.memory_space<vmem>>, vector<16x2048xf32>,
    } else {
    }
    %c0 = arith.constant 0 : index
    %c0_1 = arith.constant 0 : index
    %3 = vector.load %arg5[%c0, %c0_1] : memref<16x2048xf32, #tpu.memory_space<vmem>>, vector<16x2048xf32>
    %c0_2 = arith.constant 0 : index
    %c0_3 = arith.constant 0 : index
    %4 = vector.load %arg2[%c0_2, %c0_3] : memref<16x8xf32, #tpu.memory_space<vmem>>, vector<16x8xf32>
    %5 = arith.truncf %4 : vector<16x8xf32> to vector<16x8xbf16>
    %c0_4 = arith.constant 0 : index
    %c0_5 = arith.constant 0 : index
    %6 = vector.load %arg3[%c0_4, %c0_5] : memref<8x2048xbf16, #tpu.memory_space<vmem>>, vector<8x2048xbf16>
    %cst = arith.constant dense<0.000000e+00> : vector<16x2048xf32>
    %7 = tpu.matmul %5, %6, %cst {dimension_numbers = #tpu.dot_dimension_numbers<[1], [0], [0], [1], [0, 0, 1, 1], [], []>} : vector<16x8xbf16>, vector<8x2048xbf16>, vector<16x2048xf32> -> vector<16x2048xf32>
    %8 = arith.addf %3, %7 : vector<16x2048xf32>
    %c0_6 = arith.constant 0 : index
    %c0_7 = arith.constant 0 : index
    %9 = vector.load %arg5[%c0_6, %c0_7] : memref<16x2048xf32, #tpu.memory_space<vmem>>, vector<16x2048xf32>
    tpu.vector_store %arg5[%c0_6, %c0_7], %8 {strides = array<i32>} : memref<16x2048xf32, #tpu.memory_space<vmem>>, vector<16x2048xf32>,
    %c0_i32_8 = arith.constant 0 : i32
    %10 = arith.cmpi eq, %arg1, %c0_i32_8 : i32
    %11 = arith.extui %10 : i1 to i32
    %c0_i32_9 = arith.constant 0 : i32
    %12 = arith.cmpi ne, %11, %c0_i32_9 : i32
    scf.if %12 {
      %c0_10 = arith.constant 0 : index
      %c0_11 = arith.constant 0 : index
      %13 = vector.load %arg5[%c0_10, %c0_11] : memref<16x2048xf32, #tpu.memory_space<vmem>>, vector<16x2048xf32>
      %c0_12 = arith.constant 0 : index
      %c0_13 = arith.constant 0 : index
      %14 = vector.load %arg4[%c0_12, %c0_13] : memref<1x2048xf32, #tpu.memory_space<vmem>>, vector<1x2048xf32>
      %15 = vector.broadcast %14 : vector<1x2048xf32> to vector<16x2048xf32>
      %16 = arith.addf %13, %15 : vector<16x2048xf32>
      %cst_14 = arith.constant 0.000000e+00 : f32
      %17 = vector.broadcast %cst_14 : f32 to vector<16x2048xf32>
      %18 = arith.maximumf %16, %17 : vector<16x2048xf32>
      %c0_15 = arith.constant 0 : index
      %c0_16 = arith.constant 0 : index
      %19 = vector.load %arg5[%c0_15, %c0_16] : memref<16x2048xf32, #tpu.memory_space<vmem>>, vector<16x2048xf32>
      tpu.vector_store %arg5[%c0_15, %c0_16], %18 {strides = array<i32>} : memref<16x2048xf32, #tpu.memory_space<vmem>>, vector<16x2048xf32>,
    } else {
    }
    return
  }
  func.func @transform_0(%arg0: i32, %arg1: i32) -> (i32, i32) {
    %c0_i32 = arith.constant 0 : i32
    return %arg0, %arg1 : i32, i32
  }
  func.func @transform_1(%arg0: i32, %arg1: i32) -> (i32, i32) {
    %c0_i32 = arith.constant 0 : i32
    %c0_i32_0 = arith.constant 0 : i32
    return %arg1, %c0_i32 : i32, i32
  }
  func.func @transform_2(%arg0: i32, %arg1: i32) -> (i32, i32) {
    %c0_i32 = arith.constant 0 : i32
    %c0_i32_0 = arith.constant 0 : i32
    %c0_i32_1 = arith.constant 0 : i32
    return %c0_i32, %c0_i32_0 : i32, i32
  }
  func.func @transform_3(%arg0: i32, %arg1: i32) -> (i32, i32) {
    %c0_i32 = arith.constant 0 : i32
    %c0_i32_0 = arith.constant 0 : i32
    return %arg0, %c0_i32 : i32, i32
  }
}

</mosaic_0001>

<bundles_post_ra>
// kernel: tpu_custom_call.1
= control target key start
LH: loop header
LB: loop body
LE: loop exit
PB: predicated region body
PF: predicated region fallthrough
CT: control target
= control target key end

     0   :  { %8 = vsyncpa [#allocation3], 0  ;;  %s861_s0 = inlined_call_operand.vmem [shape: f32[16,8], index: 0, kind: input, shape index: {}]   ;;  %s862_s1 = inlined_call_operand.hbm [shape: bf16[8,2048], index: 1, kind: input, shape index: {}]   ;;  %s863_s2 = inlined_call_operand.vmem [shape: f32[1,2048], index: 2, kind: input, shape index: {}]   ;;  %s864_s3 = inlined_call_operand.hbm [shape: f32[16,2048], index: 3, kind: output, shape index: {}]  }
   0x1   :  { %9 = vsyncpa [#allocation4], 0  ;;  %s17_s14 = sshll.u32 %s862_s1, 4  ;;  %s749_s15 = smov [#allocation2]   ;;  %s18_s14 = int_to_ptr.hbm [resolvable:$true] %s17_s14 }
   0x2   :  { %s19_s16 = sshll.u32 %s749_s15, 4  ;;  %s20_s16 = int_to_ptr.vmem [resolvable:$true] %s19_s16 }
   0x3   :  { %22 = dma.hbm_to_vmem [thread:$0]  %s18_s14, 1024, %s20_s16, [#allocation3]  }
   0x4   :  { %745 = dma.done.wait [#allocation3], 1024  }
   0x5   :  { %746 = vsyncadd [#allocation3], 4294966272  ;;  %v101_v0 = vld [vmem:[#allocation2] sm:$0xff]  ;;  %vm153_vm0 = vcmask 1043456   ;;  %v102_v1 = vld [vmem:[#allocation2 + $0x8] sm:$0xff]  ;;  %vm149_vm1 = vcmask 64512  }
   0x6   :  { %v98_v2 = vld [vmem:[%s861_s0] sm:$0xff]  ;;  %v117_v3 = vunpack.c.l.b16 %v101_v0  ;;  %v118_v4 = vunpack.c.h.b16 %v101_v0  ;;  %v119_v5 = vunpack.c.l.b16 %v102_v1  ;;  %v120_v6 = vunpack.c.h.b16 %v102_v1  ;;  %v99_v7 = vld [vmem:[%s861_s0 + $0x8] sm:$0xff]  ;;  %v106_v22 = vld [vmem:[#allocation2 + $0x28] sm:$0xff]  ;;  %s663_s26 = sshll.u32 %s864_s3, 4  ;;  %s751_s27 = smov 2048   ;;  %s664_s26 = int_to_ptr.hbm [resolvable:$true] %s663_s26 }
   0x7   :  { %v104_v8 = vld [vmem:[#allocation2 + $0x18] sm:$0xff]  ;;  %v103_v9 = vld [vmem:[#allocation2 + $0x10] sm:$0xff]  ;;  %v782_v10 = vpack.c.bf16 %v99_v7, %v98_v2  ;;  %v105_v23 = vld [vmem:[#allocation2 + $0x20] sm:$0xff]  ;;  %v127_v31 = vunpack.c.l.b16 %v106_v22  ;;  %v128_v32 = vunpack.c.h.b16 %v106_v22  ;;  %s752_s28 = smov 128  }
   0x8   :  { %v123_v11 = vunpack.c.l.b16 %v104_v8  ;;  %v124_v12 = vunpack.c.h.b16 %v104_v8  ;;  %v121_v13 = vunpack.c.l.b16 %v103_v9  ;;  %v133_v14 = vpack.c.b16 %v117_v3, %v117_v3  ;;  %v108_v45 = vld [vmem:[#allocation2 + $0x38] sm:$0xff]  ;;  %v107_v46 = vld [vmem:[#allocation2 + $0x30] sm:$0xff] }
   0x9   :  { %v134_v15 = vpack.c.b16 %v118_v4, %v118_v4  ;;  %v135_v16 = vpack.c.b16 %v119_v5, %v119_v5  ;;  %v136_v17 = vpack.c.b16 %v120_v6, %v120_v6  ;;  %v122_v21 = vunpack.c.h.b16 %v103_v9  ;;  %v835_v59 = vld [vmem:[%s863_s2] sm:$0xff] }
   0xa   :  { %v139_v18 = vpack.c.b16 %v123_v11, %v123_v11  ;;  %v140_v19 = vpack.c.b16 %v124_v12, %v124_v12  ;;  %v137_v20 = vpack.c.b16 %v121_v13, %v121_v13  ;;  %v155_v24 = vsel %vm153_vm0, %v133_v14, 0 }
   0xb   :  { %v158_v25 = vsel %vm153_vm0, %v134_v15, 0  ;;  %v161_v26 = vsel %vm153_vm0, %v135_v16, 0  ;;  %v164_v27 = vsel %vm153_vm0, %v136_v17, 0  ;;  %209 = vmatpush.bf16.msra.mxu0 %v155_v24  ;;  %v138_v30 = vpack.c.b16 %v122_v21, %v122_v21 }
   0xc   :  { %223 = vmatpush.bf16.msra.mxu1 %v158_v25  ;;  %v173_v28 = vsel %vm153_vm0, %v139_v18, 0  ;;  %v176_v29 = vsel %vm153_vm0, %v140_v19, 0  ;;  %237 = vmatpush.bf16.msra.mxu2 %v161_v26  ;;  %v125_v33 = vunpack.c.l.b16 %v105_v23  ;;  %v126_v34 = vunpack.c.h.b16 %v105_v23 }
   0xd   :  { %251 = vmatpush.bf16.msra.mxu3 %v164_v27  ;;  %v167_v35 = vsel %vm153_vm0, %v137_v20, 0  ;;  %v170_v36 = vsel %vm153_vm0, %v138_v30, 0  ;;  %v143_v37 = vpack.c.b16 %v127_v31, %v127_v31  ;;  %v144_v38 = vpack.c.b16 %v128_v32, %v128_v32 }
   0xe   :  { %676 = vmatmul.msk.bf16.vlgmr.msra.gmra.mxu0 %vm149_vm1, %v782_v10  ;;  %v141_v39 = vpack.c.b16 %v125_v33, %v125_v33  ;;  %v142_v40 = vpack.c.b16 %v126_v34, %v126_v34  ;;  %v131_v47 = vunpack.c.l.b16 %v108_v45  ;;  %v132_v48 = vunpack.c.h.b16 %v108_v45 }
   0xf   :  { %677 = vmatmul.msk.bf16.vlgmr.msra.gmra.mxu1 %vm149_vm1, %v782_v10  ;;  %678 = vmatmul.msk.bf16.vlgmr.msra.gmra.mxu2 %vm149_vm1, %v782_v10  ;;  %v185_v41 = vsel %vm153_vm0, %v143_v37, 0  ;;  %v188_v42 = vsel %vm153_vm0, %v144_v38, 0  ;;  %v129_v49 = vunpack.c.l.b16 %v107_v46  ;;  %v130_v50 = vunpack.c.h.b16 %v107_v46 }
  0x10   :  { %293 = vmatpush.bf16.msrb.mxu2 %v173_v28  ;;  %679 = vmatmul.msk.bf16.vlgmr.msra.gmra.mxu3 %vm149_vm1, %v782_v10  ;;  %v179_v43 = vsel %vm153_vm0, %v141_v39, 0  ;;  %v182_v44 = vsel %vm153_vm0, %v142_v40, 0  ;;  %v147_v51 = vpack.c.b16 %v131_v47, %v131_v47  ;;  %v148_v52 = vpack.c.b16 %v132_v48, %v132_v48 }
  0x11   :  { %307 = vmatpush.bf16.msrb.mxu3 %v176_v29  ;;  %265 = vmatpush.bf16.msrb.mxu0 %v167_v35  ;;  %v145_v53 = vpack.c.b16 %v129_v49, %v129_v49  ;;  %v146_v54 = vpack.c.b16 %v130_v50, %v130_v50  ;;  %v529_v60 = vperm.slane %v835_v59, 0  ;;  %v530_v61 = vperm.slane %v835_v59, 1 }
  0x12   :  { %279 = vmatpush.bf16.msrb.mxu1 %v170_v36  ;;  %v197_v55 = vsel %vm153_vm0, %v147_v51, 0  ;;  %v200_v56 = vsel %vm153_vm0, %v148_v52, 0  ;;  %v531_v4 = vperm.slane %v835_v59, 2  ;;  %v532_v5 = vperm.slane %v835_v59, 3 }
  0x13   :  { %v191_v57 = vsel %vm153_vm0, %v145_v53, 0  ;;  %v194_v58 = vsel %vm153_vm0, %v146_v54, 0  ;;  %v533_v20 = vperm.slane %v835_v59, 4  ;;  %v534_v21 = vperm.slane %v835_v59, 5 }
  0x14   :  { %349 = vmatpush.bf16.msra.mxu2 %v185_v41  ;;  %v535_v32 = vperm.slane %v835_v59, 6  ;;  %v536_v33 = vperm.slane %v835_v59, 7 }
  0x15   :  { %363 = vmatpush.bf16.msra.mxu3 %v188_v42  ;;  %321 = vmatpush.bf16.msra.mxu0 %v179_v43 }
  0x16   :  { %335 = vmatpush.bf16.msra.mxu1 %v182_v44  ;;  %v848_v44 = vld [vmem:[%s863_s2 + $0x8] sm:$0xff]  ;;  %s750_s2 = smov [#allocation5]  }
  0x17   :  { %v537_v49 = vperm.slane %v848_v44, 0  ;;  %v538_v50 = vperm.slane %v848_v44, 1  ;;  %s661_s23 = sshll.u32 %s750_s2, 4  ;;  %s662_s23 = int_to_ptr.vmem [resolvable:$true] %s661_s23 }
  0x1e   :  { %680 = vmatmul.msk.bf16.vlgmr.msrb.gmra.mxu0 %vm149_vm1, %v782_v10 }
  0x1f   :  { %681 = vmatmul.msk.bf16.vlgmr.msrb.gmra.mxu1 %vm149_vm1, %v782_v10  ;;  %682 = vmatmul.msk.bf16.vlgmr.msrb.gmra.mxu2 %vm149_vm1, %v782_v10 }
  0x20   :  { %683 = vmatmul.msk.bf16.vlgmr.msrb.gmra.mxu3 %vm149_vm1, %v782_v10  ;;  %405 = vmatpush.bf16.msrb.mxu2 %v197_v55 }
  0x21   :  { %419 = vmatpush.bf16.msrb.mxu3 %v200_v56  ;;  %377 = vmatpush.bf16.msrb.mxu0 %v191_v57 }
  0x22   :  { %391 = vmatpush.bf16.msrb.mxu1 %v194_v58 }
  0x2e   :  { %684 = vmatmul.msk.bf16.vlgmr.msra.gmra.mxu0 %vm149_vm1, %v782_v10 }
  0x2f   :  { %685 = vmatmul.msk.bf16.vlgmr.msra.gmra.mxu1 %vm149_vm1, %v782_v10  ;;  %686 = vmatmul.msk.bf16.vlgmr.msra.gmra.mxu2 %vm149_vm1, %v782_v10 }
  0x30   :  { %687 = vmatmul.msk.bf16.vlgmr.msra.gmra.mxu3 %vm149_vm1, %v782_v10 }
  0x3e   :  { %688 = vmatmul.msk.bf16.vlgmr.msrb.gmra.mxu0 %vm149_vm1, %v782_v10 }
  0x3f   :  { %689 = vmatmul.msk.bf16.vlgmr.msrb.gmra.mxu1 %vm149_vm1, %v782_v10  ;;  %690 = vmatmul.msk.bf16.vlgmr.msrb.gmra.mxu2 %vm149_vm1, %v782_v10 }
  0x40   :  { %691 = vmatmul.msk.bf16.vlgmr.msrb.gmra.mxu3 %vm149_vm1, %v782_v10 }
  0x8b   :  { %v211_v62 = vpop.f32.mrf.mxu0 }
  0x8c   :  { %v225_v63 = vpop.f32.mrf.mxu1  ;;  %v561_v0 = vadd.f32 %v529_v60, %v211_v62  ;;  %v540_v62 = vperm.slane %v848_v44, 3 }
  0x8d   :  { %v562_v1 = vadd.f32 %v530_v61, %v225_v63 }
  0x8e   :  { %v593_v2 = vmax.f32 %v561_v0, 0.0 }
  0x8f   :  { %v594_v3 = vmax.f32 %v562_v1, 0.0 }
  0x90   :  { %625 = vst [vmem:[#allocation5] sm:$0xff] %v593_v2 }
  0x91   :  { %626 = vst [vmem:[#allocation5 + $0x8] sm:$0xff] %v594_v3 }
  0x92   :  { %v239_v6 = vpop.f32.mrf.mxu2 }
  0x93   :  { %v253_v7 = vpop.f32.mrf.mxu3  ;;  %v213_v8 = vpop.f32.mrf.mxu0  ;;  %v563_v10 = vadd.f32 %v531_v4, %v239_v6 }
  0x94   :  { %v227_v9 = vpop.f32.mrf.mxu1  ;;  %v564_v11 = vadd.f32 %v532_v5, %v253_v7  ;;  %v577_v12 = vadd.f32 %v529_v60, %v213_v8 }
  0x95   :  { %v578_v13 = vadd.f32 %v530_v61, %v227_v9  ;;  %v595_v14 = vmax.f32 %v563_v10, 0.0  ;;  %v539_v61 = vperm.slane %v848_v44, 2 }
  0x96   :  { %v596_v15 = vmax.f32 %v564_v11, 0.0  ;;  %v609_v16 = vmax.f32 %v577_v12, 0.0 }
  0x97   :  { %v610_v17 = vmax.f32 %v578_v13, 0.0  ;;  %627 = vst [vmem:[#allocation5 + $0x10] sm:$0xff] %v595_v14  ;;  %v541_v13 = vperm.slane %v848_v44, 4  ;;  %v542_v14 = vperm.slane %v848_v44, 5 }
  0x98   :  { %628 = vst [vmem:[#allocation5 + $0x18] sm:$0xff] %v596_v15 }
  0x99   :  { %641 = vst [vmem:[#allocation5 + $0x80] sm:$0xff] %v609_v16 }
  0x9a   :  { %v241_v18 = vpop.f32.mrf.mxu2  ;;  %642 = vst [vmem:[#allocation5 + $0x88] sm:$0xff] %v610_v17 }
  0x9b   :  { %v255_v19 = vpop.f32.mrf.mxu3  ;;  %v267_v22 = vpop.f32.mrf.mxu0  ;;  %v579_v24 = vadd.f32 %v531_v4, %v241_v18 }
  0x9c   :  { %v281_v23 = vpop.f32.mrf.mxu1  ;;  %v580_v25 = vadd.f32 %v532_v5, %v255_v19  ;;  %v565_v26 = vadd.f32 %v533_v20, %v267_v22 }
  0x9d   :  { %v566_v27 = vadd.f32 %v534_v21, %v281_v23  ;;  %v611_v28 = vmax.f32 %v579_v24, 0.0 }
  0x9e   :  { %v612_v29 = vmax.f32 %v580_v25, 0.0  ;;  %v597_v30 = vmax.f32 %v565_v26, 0.0  ;;  %v543_v25 = vperm.slane %v848_v44, 6  ;;  %v544_v26 = vperm.slane %v848_v44, 7 }
  0x9f   :  { %v598_v31 = vmax.f32 %v566_v27, 0.0  ;;  %643 = vst [vmem:[#allocation5 + $0x90] sm:$0xff] %v611_v28 }
  0xa0   :  { %644 = vst [vmem:[#allocation5 + $0x98] sm:$0xff] %v612_v29 }
  0xa1   :  { %629 = vst [vmem:[#allocation5 + $0x20] sm:$0xff] %v597_v30 }
  0xa2   :  { %v295_v34 = vpop.f32.mrf.mxu2  ;;  %630 = vst [vmem:[#allocation5 + $0x28] sm:$0xff] %v598_v31 }
  0xa3   :  { %v309_v35 = vpop.f32.mrf.mxu3  ;;  %v269_v36 = vpop.f32.mrf.mxu0  ;;  %v567_v38 = vadd.f32 %v535_v32, %v295_v34 }
  0xa4   :  { %v283_v37 = vpop.f32.mrf.mxu1  ;;  %v568_v39 = vadd.f32 %v536_v33, %v309_v35  ;;  %v581_v40 = vadd.f32 %v533_v20, %v269_v36 }
  0xa5   :  { %v582_v41 = vadd.f32 %v534_v21, %v283_v37  ;;  %v599_v42 = vmax.f32 %v567_v38, 0.0 }
  0xa6   :  { %v600_v43 = vmax.f32 %v568_v39, 0.0  ;;  %v613_v45 = vmax.f32 %v581_v40, 0.0 }
  0xa7   :  { %v614_v46 = vmax.f32 %v582_v41, 0.0  ;;  %631 = vst [vmem:[#allocation5 + $0x30] sm:$0xff] %v599_v42 }
  0xa8   :  { %632 = vst [vmem:[#allocation5 + $0x38] sm:$0xff] %v600_v43 }
  0xa9   :  { %645 = vst [vmem:[#allocation5 + $0xa0] sm:$0xff] %v613_v45 }
  0xaa   :  { %v297_v47 = vpop.f32.mrf.mxu2  ;;  %646 = vst [vmem:[#allocation5 + $0xa8] sm:$0xff] %v614_v46 }
  0xab   :  { %v311_v48 = vpop.f32.mrf.mxu3  ;;  %v323_v51 = vpop.f32.mrf.mxu0  ;;  %v583_v53 = vadd.f32 %v535_v32, %v297_v47 }
  0xac   :  { %v337_v52 = vpop.f32.mrf.mxu1  ;;  %v584_v54 = vadd.f32 %v536_v33, %v311_v48  ;;  %v569_v55 = vadd.f32 %v537_v49, %v323_v51 }
  0xad   :  { %v570_v56 = vadd.f32 %v538_v50, %v337_v52  ;;  %v615_v57 = vmax.f32 %v583_v53, 0.0 }
  0xae   :  { %v616_v58 = vmax.f32 %v584_v54, 0.0  ;;  %v601_v59 = vmax.f32 %v569_v55, 0.0 }
  0xaf   :  { %v602_v60 = vmax.f32 %v570_v56, 0.0  ;;  %647 = vst [vmem:[#allocation5 + $0xb0] sm:$0xff] %v615_v57 }
  0xb0   :  { %648 = vst [vmem:[#allocation5 + $0xb8] sm:$0xff] %v616_v58 }
  0xb1   :  { %633 = vst [vmem:[#allocation5 + $0x40] sm:$0xff] %v601_v59 }
  0xb2   :  { %v351_v63 = vpop.f32.mrf.mxu2  ;;  %634 = vst [vmem:[#allocation5 + $0x48] sm:$0xff] %v602_v60 }
  0xb3   :  { %v365_v0 = vpop.f32.mrf.mxu3  ;;  %v325_v1 = vpop.f32.mrf.mxu0  ;;  %v571_v3 = vadd.f32 %v539_v61, %v351_v63 }
  0xb4   :  { %v339_v2 = vpop.f32.mrf.mxu1  ;;  %v572_v4 = vadd.f32 %v540_v62, %v365_v0  ;;  %v585_v5 = vadd.f32 %v537_v49, %v325_v1 }
  0xb5   :  { %v586_v6 = vadd.f32 %v538_v50, %v339_v2  ;;  %v603_v7 = vmax.f32 %v571_v3, 0.0 }
  0xb6   :  { %v604_v8 = vmax.f32 %v572_v4, 0.0  ;;  %v617_v9 = vmax.f32 %v585_v5, 0.0 }
  0xb7   :  { %v618_v10 = vmax.f32 %v586_v6, 0.0  ;;  %635 = vst [vmem:[#allocation5 + $0x50] sm:$0xff] %v603_v7 }
  0xb8   :  { %636 = vst [vmem:[#allocation5 + $0x58] sm:$0xff] %v604_v8 }
  0xb9   :  { %649 = vst [vmem:[#allocation5 + $0xc0] sm:$0xff] %v617_v9 }
  0xba   :  { %v353_v11 = vpop.f32.mrf.mxu2  ;;  %650 = vst [vmem:[#allocation5 + $0xc8] sm:$0xff] %v618_v10 }
  0xbb   :  { %v367_v12 = vpop.f32.mrf.mxu3  ;;  %v379_v15 = vpop.f32.mrf.mxu0  ;;  %v587_v17 = vadd.f32 %v539_v61, %v353_v11 }
  0xbc   :  { %v393_v16 = vpop.f32.mrf.mxu1  ;;  %v588_v18 = vadd.f32 %v540_v62, %v367_v12  ;;  %v573_v19 = vadd.f32 %v541_v13, %v379_v15 }
  0xbd   :  { %v574_v20 = vadd.f32 %v542_v14, %v393_v16  ;;  %v619_v21 = vmax.f32 %v587_v17, 0.0 }
  0xbe   :  { %v620_v22 = vmax.f32 %v588_v18, 0.0  ;;  %v605_v23 = vmax.f32 %v573_v19, 0.0 }
  0xbf   :  { %v606_v24 = vmax.f32 %v574_v20, 0.0  ;;  %651 = vst [vmem:[#allocation5 + $0xd0] sm:$0xff] %v619_v21 }
  0xc0   :  { %652 = vst [vmem:[#allocation5 + $0xd8] sm:$0xff] %v620_v22 }
  0xc1   :  { %637 = vst [vmem:[#allocation5 + $0x60] sm:$0xff] %v605_v23 }
  0xc2   :  { %v407_v27 = vpop.f32.mrf.mxu2  ;;  %638 = vst [vmem:[#allocation5 + $0x68] sm:$0xff] %v606_v24 }
  0xc3   :  { %v421_v28 = vpop.f32.mrf.mxu3  ;;  %v381_v29 = vpop.f32.mrf.mxu0  ;;  %v575_v31 = vadd.f32 %v543_v25, %v407_v27 }
  0xc4   :  { %v395_v30 = vpop.f32.mrf.mxu1  ;;  %v576_v32 = vadd.f32 %v544_v26, %v421_v28  ;;  %v589_v33 = vadd.f32 %v541_v13, %v381_v29 }
  0xc5   :  { %v590_v34 = vadd.f32 %v542_v14, %v395_v30  ;;  %v607_v35 = vmax.f32 %v575_v31, 0.0 }
  0xc6   :  { %v608_v36 = vmax.f32 %v576_v32, 0.0  ;;  %v621_v37 = vmax.f32 %v589_v33, 0.0 }
  0xc7   :  { %v622_v38 = vmax.f32 %v590_v34, 0.0  ;;  %639 = vst [vmem:[#allocation5 + $0x70] sm:$0xff] %v607_v35 }
  0xc8   :  { %640 = vst [vmem:[#allocation5 + $0x78] sm:$0xff] %v608_v36 }
  0xc9   :  { %653 = vst [vmem:[#allocation5 + $0xe0] sm:$0xff] %v621_v37 }
  0xca   :  { %v409_v39 = vpop.f32.mrf.mxu2  ;;  %654 = vst [vmem:[#allocation5 + $0xe8] sm:$0xff] %v622_v38 }
  0xcb   :  { %v423_v40 = vpop.f32.mrf.mxu3  ;;  %v591_v41 = vadd.f32 %v543_v25, %v409_v39 }
  0xcc   :  { %v592_v42 = vadd.f32 %v544_v26, %v423_v40 }
  0xcd   :  { %v623_v43 = vmax.f32 %v591_v41, 0.0 }
  0xce   :  { %v624_v44 = vmax.f32 %v592_v42, 0.0 }
  0xcf   :  { %655 = vst [vmem:[#allocation5 + $0xf0] sm:$0xff] %v623_v43 }
  0xd0   :  { %656 = vst [vmem:[#allocation5 + $0xf8] sm:$0xff] %v624_v44 }
  0xd1   :  { %669 = dma.vmem_to_hbm [thread:$0]  %s662_s23, 4096, %s664_s26, [#allocation4], %s751_s27, %s751_s27, %s752_s28  }
  0xd2   :  { %747 = dma.done.wait [#allocation4], 4096  }
  0xd3   :  { %748 = vsyncadd [#allocation4], 4294963200 }
  0xd4   :  { %674 = vsyncpa [#allocation3], 1 }
  0xd5   :  { %675 = vsyncpa [#allocation4], 1 }

</bundles_post_ra>
